<compile_context>
chip_gen: v7x
topology: tpu7x:2x2x1
jax: 0.10.0
libtpu: 0.0.40
codegen_flags: <defaults>
</compile_context>

<pallas_src>
import jax
import jax.numpy as jnp
from jax import lax
from jax.experimental import pallas as pl
from jax.experimental.pallas import tpu as pltpu


def _linear_softmax_kernel(f_ref, w_ref, b_ref, p_ref):
    # f_ref : (N, tk)  f32   feature chunk (both halves fused: full batch N)
    # w_ref : (C, tk)  f32   classifier weight chunk (original (C, D) layout)
    # b_ref : (1, C)   f32   classifier bias
    # p_ref : (N, C)   f32   output; doubles as the logits accumulator over k
    k = pl.program_id(0)

    @pl.when(k == 0)
    def _():
        p_ref[...] = jnp.zeros_like(p_ref)

    # logits chunk: contract the D-tile on the last axis of both operands
    # (f32 x f32 -> f32 on the MXU; kernel is HBM-bound so precision is free).
    p_ref[...] += lax.dot_general(
        f_ref[...], w_ref[...],
        dimension_numbers=(((1,), (1,)), ((), ())),
        preferred_element_type=jnp.float32,
    )

    @pl.when(k == pl.num_programs(0) - 1)
    def _():
        logits = p_ref[...] + b_ref[...]                       # (N, C) f32
        # numerically stable row-wise softmax, exact divide (runs once; the
        # extra accuracy matters for the nuclear-norm difference downstream).
        m = jnp.max(logits, axis=-1, keepdims=True)
        e = jnp.exp(logits - m)
        denom = jnp.sum(e, axis=-1, keepdims=True)
        p_ref[...] = e / denom


def _per_step_vmem_bytes(N, C, tk):
    # double-buffered f32 input streams + bias + resident f32 output/accumulator
    return (2 * (N * tk + C * tk + C) + N * C) * 4


def nuclear_wasserstein_discrepancy(f, weight, bias):
    """f: (N, D) features, weight: (C, D), bias: (C,). Returns scalar loss."""
    N, D = f.shape
    C = weight.shape[0]
    assert N % 2 == 0
    B = N // 2

    f = f.astype(jnp.float32)
    weight = weight.astype(jnp.float32)
    b2d = bias.astype(jnp.float32).reshape(1, C)

    # Per-generation VMEM budget: ~3/4 of physical (48 MiB on v7x's 64 MiB,
    # ~96 MiB on v5e/v6e's 128 MiB).
    try:
        phys_vmem = pltpu.get_tpu_info().vmem_capacity_bytes
    except Exception:
        phys_vmem = 64 << 20          # conservative fallback (v7x per-TC)
    cap = int(phys_vmem * 3 // 4)
    headroom = 4 << 20

    # D-tile: prefer a single k step (fewest grid steps, longest DMAs, no pad);
    # otherwise the largest lane-aligned power-of-two chunk within budget.
    if _per_step_vmem_bytes(N, C, D) + headroom <= cap:
        tk = D
    else:
        tk = 128
        while tk * 2 <= D and _per_step_vmem_bytes(N, C, tk * 2) + headroom <= cap:
            tk *= 2
    if D % tk != 0:
        # fallback only (adds an HBM copy); typical hidden sizes divide cleanly.
        d_pad = ((D + tk - 1) // tk) * tk - D
        f = jnp.pad(f, ((0, 0), (0, d_pad)))
        weight = jnp.pad(weight, ((0, 0), (0, d_pad)))
    k_steps = f.shape[-1] // tk

    vmem_limit = int(min(cap, max(_per_step_vmem_bytes(N, C, tk) + headroom,
                                  16 << 20)))

    grid_spec = pltpu.PrefetchScalarGridSpec(
        num_scalar_prefetch=0,
        grid=(k_steps,),
        in_specs=[
            pl.BlockSpec((N, tk), lambda k: (0, k)),
            pl.BlockSpec((C, tk), lambda k: (0, k)),
            pl.BlockSpec((1, C), lambda k: (0, 0)),
        ],
        out_specs=pl.BlockSpec((N, C), lambda k: (0, 0)),
    )

    p = pl.pallas_call(
        _linear_softmax_kernel,
        out_shape=jax.ShapeDtypeStruct((N, C), jnp.float32),
        grid_spec=grid_spec,
        compiler_params=pltpu.CompilerParams(
            dimension_semantics=("arbitrary",),
            vmem_limit_bytes=vmem_limit,
        ),
    )(f, weight, b2d)

    # Nuclear norm of the tiny (B, C) softmax matrices in plain JAX.
    # TODO(synk): SVD has no clean Pallas equivalent; done in JAX.
    p_s, p_t = p[:B], p[B:]
    nuc_s = jnp.sum(jnp.linalg.svd(p_s, compute_uv=False))
    nuc_t = jnp.sum(jnp.linalg.svd(p_t, compute_uv=False))
    loss = (nuc_s - nuc_t) / jnp.float32(B)
    # reference: `if loss > 1000.0: loss = 0`
    loss = jnp.where(loss > 1000.0, jnp.zeros_like(loss), loss)
    return loss


def _reference_jax(f, weight, bias):
    """Pure-JAX reference for sanity checking."""
    logits = f @ weight.T + bias
    p = jax.nn.softmax(logits, axis=-1)
    B = f.shape[0] // 2
    p_s, p_t = p[:B], p[B:]
    nuc_s = jnp.sum(jnp.linalg.svd(p_s, compute_uv=False))
    nuc_t = jnp.sum(jnp.linalg.svd(p_t, compute_uv=False))
    loss = (nuc_s - nuc_t) / B
    return jnp.where(loss > 1000.0, jnp.zeros_like(loss), loss)


if __name__ == "__main__":
    key = jax.random.PRNGKey(0)
    k_f, k_w, k_b = jax.random.split(key, 3)

    # small shapes: total batch N = 8 (4 source + 4 target), hidden D = 32, classes C = 8
    N, D, C = 8, 32, 8
    f = jax.random.normal(k_f, (N, D), dtype=jnp.float32)
    # deterministic classifier parameters (Linear(D, C))
    weight = jax.random.normal(k_w, (C, D), dtype=jnp.float32) * (1.0 / jnp.sqrt(D))
    bias = jax.random.normal(k_b, (C,), dtype=jnp.float32) * 0.01

    loss = nuclear_wasserstein_discrepancy(f, weight, bias)
    loss = jax.block_until_ready(loss)

    # Full-precision comparison: kernel keeps f32 end to end (no bf16 staging),
    # so it should track the pure-JAX reference tightly.
    ref = jax.block_until_ready(_reference_jax(f, weight, bias))
    assert jnp.allclose(loss, ref, atol=1e-4, rtol=1e-4), (loss, ref)

    print("KERNEL_OK")
</pallas_src>

<mosaic_0001>
module attributes {stable_mosaic.version = 11 : i64} {
  func.func @_linear_softmax_kernel(%arg0: i32, %arg1: memref<8x32xf32, #tpu.memory_space<vmem>>, %arg2: memref<8x32xf32, #tpu.memory_space<vmem>>, %arg3: memref<1x8xf32, #tpu.memory_space<vmem>>, %arg4: memref<8x8xf32, #tpu.memory_space<vmem>>) attributes {dimension_semantics = [#tpu.dimension_semantics<arbitrary>], iteration_bounds = array<i64: 1>, scalar_prefetch = 0 : i64, scratch_operands = 0 : i64, tpu.core_type = #tpu.core_type<tc>, window_params = [{transform_indices = @transform_0, window_bounds = array<i64: 8, 32>}, {transform_indices = @transform_1, window_bounds = array<i64: 8, 32>}, {pipeline_mode = #tpu.pipeline_mode<synchronous>, transform_indices = @transform_2, window_bounds = array<i64: 1, 8>}, {pipeline_mode = #tpu.pipeline_mode<synchronous>, transform_indices = @transform_3, window_bounds = array<i64: 8, 8>}]} {
    %c0_i32 = arith.constant 0 : i32
    %0 = arith.cmpi eq, %arg0, %c0_i32 : i32
    %1 = arith.extui %0 : i1 to i32
    %c0_i32_0 = arith.constant 0 : i32
    %2 = arith.cmpi ne, %1, %c0_i32_0 : i32
    scf.if %2 {
      %cst_10 = arith.constant 0.000000e+00 : f32
      %12 = vector.broadcast %cst_10 : f32 to vector<8x8xf32>
      %c0_11 = arith.constant 0 : index
      %c0_12 = arith.constant 0 : index
      %13 = vector.load %arg4[%c0_11, %c0_12] : memref<8x8xf32, #tpu.memory_space<vmem>>, vector<8x8xf32>
      tpu.vector_store %arg4[%c0_11, %c0_12], %12 {strides = array<i32>} : memref<8x8xf32, #tpu.memory_space<vmem>>, vector<8x8xf32>,
    } else {
    }
    %c0 = arith.constant 0 : index
    %c0_1 = arith.constant 0 : index
    %3 = vector.load %arg4[%c0, %c0_1] : memref<8x8xf32, #tpu.memory_space<vmem>>, vector<8x8xf32>
    %c0_2 = arith.constant 0 : index
    %c0_3 = arith.constant 0 : index
    %4 = vector.load %arg1[%c0_2, %c0_3] : memref<8x32xf32, #tpu.memory_space<vmem>>, vector<8x32xf32>
    %c0_4 = arith.constant 0 : index
    %c0_5 = arith.constant 0 : index
    %5 = vector.load %arg2[%c0_4, %c0_5] : memref<8x32xf32, #tpu.memory_space<vmem>>, vector<8x32xf32>
    %cst = arith.constant dense<0.000000e+00> : vector<8x8xf32>
    %6 = tpu.matmul %4, %5, %cst {dimension_numbers = #tpu.dot_dimension_numbers<[1], [1], [0], [0], [0, 0, 1, 0], [], []>} : vector<8x32xf32>, vector<8x32xf32>, vector<8x8xf32> -> vector<8x8xf32>
    %7 = arith.addf %3, %6 : vector<8x8xf32>
    %c0_6 = arith.constant 0 : index
    %c0_7 = arith.constant 0 : index
    %8 = vector.load %arg4[%c0_6, %c0_7] : memref<8x8xf32, #tpu.memory_space<vmem>>, vector<8x8xf32>
    tpu.vector_store %arg4[%c0_6, %c0_7], %7 {strides = array<i32>} : memref<8x8xf32, #tpu.memory_space<vmem>>, vector<8x8xf32>,
    %c0_i32_8 = arith.constant 0 : i32
    %9 = arith.cmpi eq, %arg0, %c0_i32_8 : i32
    %10 = arith.extui %9 : i1 to i32
    %c0_i32_9 = arith.constant 0 : i32
    %11 = arith.cmpi ne, %10, %c0_i32_9 : i32
    scf.if %11 {
      %c0_10 = arith.constant 0 : index
      %c0_11 = arith.constant 0 : index
      %12 = vector.load %arg4[%c0_10, %c0_11] : memref<8x8xf32, #tpu.memory_space<vmem>>, vector<8x8xf32>
      %c0_12 = arith.constant 0 : index
      %c0_13 = arith.constant 0 : index
      %13 = vector.load %arg3[%c0_12, %c0_13] : memref<1x8xf32, #tpu.memory_space<vmem>>, vector<1x8xf32>
      %14 = vector.broadcast %13 : vector<1x8xf32> to vector<8x8xf32>
      %15 = arith.addf %12, %14 : vector<8x8xf32>
      %cst_14 = arith.constant dense<0xFF800000> : vector<8xf32>
      %16 = vector.multi_reduction <maximumf>, %15, %cst_14 [1] : vector<8x8xf32> to vector<8xf32>
      %17 = vector.shape_cast %16 : vector<8xf32> to vector<8x1xf32>
      %18 = vector.broadcast %17 : vector<8x1xf32> to vector<8x8xf32>
      %19 = arith.subf %15, %18 : vector<8x8xf32>
      %20 = math.exp %19 : vector<8x8xf32>
      %cst_15 = arith.constant dense<0.000000e+00> : vector<8xf32>
      %21 = vector.multi_reduction <add>, %20, %cst_15 [1] : vector<8x8xf32> to vector<8xf32>
      %22 = vector.shape_cast %21 : vector<8xf32> to vector<8x1xf32>
      %23 = vector.broadcast %22 : vector<8x1xf32> to vector<8x8xf32>
      %24 = arith.divf %20, %23 : vector<8x8xf32>
      %c0_16 = arith.constant 0 : index
      %c0_17 = arith.constant 0 : index
      %25 = vector.load %arg4[%c0_16, %c0_17] : memref<8x8xf32, #tpu.memory_space<vmem>>, vector<8x8xf32>
      tpu.vector_store %arg4[%c0_16, %c0_17], %24 {strides = array<i32>} : memref<8x8xf32, #tpu.memory_space<vmem>>, vector<8x8xf32>,
    } else {
    }
    return
  }
  func.func @transform_0(%arg0: i32) -> (i32, i32) {
    %c0_i32 = arith.constant 0 : i32
    %c0_i32_0 = arith.constant 0 : i32
    return %c0_i32, %arg0 : i32, i32
  }
  func.func @transform_1(%arg0: i32) -> (i32, i32) {
    %c0_i32 = arith.constant 0 : i32
    %c0_i32_0 = arith.constant 0 : i32
    return %c0_i32, %arg0 : i32, i32
  }
  func.func @transform_2(%arg0: i32) -> (i32, i32) {
    %c0_i32 = arith.constant 0 : i32
    %c0_i32_0 = arith.constant 0 : i32
    %c0_i32_1 = arith.constant 0 : i32
    return %c0_i32, %c0_i32_0 : i32, i32
  }
  func.func @transform_3(%arg0: i32) -> (i32, i32) {
    %c0_i32 = arith.constant 0 : i32
    %c0_i32_0 = arith.constant 0 : i32
    %c0_i32_1 = arith.constant 0 : i32
    return %c0_i32, %c0_i32_0 : i32, i32
  }
}

</mosaic_0001>

<bundles_post_ra>
// kernel: tpu_custom_call.1
= control target key start
LH: loop header
LB: loop body
LE: loop exit
PB: predicated region body
PF: predicated region fallthrough
CT: control target
= control target key end

     0   :  { %8 = vsyncpa [#allocation3], 0  ;;  %s328_s0 = inlined_call_operand.hbm [shape: f32[8,32], index: 0, kind: input, shape index: {}]   ;;  %s329_s1 = inlined_call_operand.hbm [shape: f32[8,32], index: 1, kind: input, shape index: {}]   ;;  %s330_s2 = inlined_call_operand.vmem [shape: f32[1,8], index: 2, kind: input, shape index: {}]   ;;  %s331_s3 = inlined_call_operand.hbm [shape: f32[8,8], index: 3, kind: output, shape index: {}]  }
   0x1   :  { %9 = vsyncpa [#allocation6], 0 }
   0x2   :  { %10 = vsyncpa [#allocation4], 0  ;;  %s259_s12 = smov [#allocation2]   ;;  %s260_s14 = smov [#allocation5]  }
   0x3   :  { %s17_s13 = sshll.u32 %s259_s12, 4  ;;  %s27_s15 = sshll.u32 %s260_s14, 4  ;;  %s18_s13 = int_to_ptr.vmem [resolvable:$true] %s17_s13  ;;  %s28_s15 = int_to_ptr.vmem [resolvable:$true] %s27_s15 }
   0x4   :  { %s187_s18 = scalar_lea.hbm %s328_s0, 128 }
   0x5   :  { %p188_p0 = scmp.ne.s32.totalorder %s328_s0, %s187_s18  ;;  %p191_p1 = scmp.lt.u32.totalorder %s187_s18, %s328_s0 }
   0x7   :  { %p193_p2 = pnand %p191_p1, %p188_p0 }
   0x9   :  { %196 = shalt.err (!%p193_p2)
}
   0xa   :  { %s197_s23 = scalar_lea.vmem %s18_s13, 128  ;;  %p202_p4 = scmp.lt.s32.totalorder %s18_s13, %s18_s13 }
   0xb   :  { %p198_p3 = scmp.ne.s32.totalorder %s18_s13, %s197_s23  ;;  %p203_p5 = scmp.lt.s32.totalorder %s197_s23, %s197_s23 }
   0xd   :  { %p204_p6 = por %p203_p5, %p202_p4 }
   0xf   :  { %p205_p7 = pnand %p204_p6, %p198_p3 }
  0x11   :  { %208 = shalt.err (!%p205_p7)
}
  0x12   :  { %20 = dma.hbm_to_vmem [thread:$0]  %s328_s0, 128, %s18_s13, [#allocation3]  }
  0x13   :  { %s209_s28 = scalar_lea.hbm %s329_s1, 128 }
  0x14   :  { %p210_p8 = scmp.ne.s32.totalorder %s329_s1, %s209_s28  ;;  %p213_p9 = scmp.lt.u32.totalorder %s209_s28, %s329_s1 }
  0x16   :  { %p215_p10 = pnand %p213_p9, %p210_p8 }
  0x18   :  { %218 = shalt.err (!%p215_p10)
}
  0x19   :  { %s219_s6 = scalar_lea.vmem %s28_s15, 128  ;;  %p224_p12 = scmp.lt.s32.totalorder %s28_s15, %s28_s15 }
  0x1a   :  { %p220_p11 = scmp.ne.s32.totalorder %s28_s15, %s219_s6  ;;  %p225_p13 = scmp.lt.s32.totalorder %s219_s6, %s219_s6 }
  0x1c   :  { %p226_p0 = por %p225_p13, %p224_p12 }
  0x1e   :  { %p227_p1 = pnand %p226_p0, %p220_p11 }
  0x20   :  { %230 = shalt.err (!%p227_p1)
}
  0x21   :  { %30 = dma.hbm_to_vmem [thread:$0]  %s329_s1, 128, %s28_s15, [#allocation6]  }
  0x22   :  { %253 = dma.done.wait [#allocation3], 128  }
  0x23   :  { %254 = vsyncadd [#allocation3], 4294967168 }
  0x24   :  { %255 = dma.done.wait [#allocation6], 128  }
  0x25   :  { %256 = vsyncadd [#allocation6], 4294967168  ;;  %vm43_vm0 = vcmask 64512   ;;  %v261_v0 = vmov 0.0   ;;  %vm262_vm1 = vmmov 0   ;;  %vm48_vm2 = vcmask 261120  }
  0x26   :  { %44 = vst.msk [vmem:[#allocation7] sm:$0xff] %vm43_vm0, %v261_v0  ;;  %173 = vmatprep.subr.mxu0 %v261_v0  ;;  %175 = vmatprep.mubr.msk.f32.mxu0 %vm262_vm1, %v261_v0  ;;  %v47_v1 = vld [vmem:[#allocation5] sm:$0xff]  ;;  %v46_v2 = vld [vmem:[#allocation2] sm:$0xff]  ;;  %s263_s9 = smov [#allocation7]  }
  0x27   :  { %174 = vmatpush3.xpose.msk.msra.mxu0 %vm48_vm2, %v47_v1  ;;  %v170_v7 = vld [vmem:[%s330_s2] ss:$0 sm:$0xff]  ;;  %s158_s10 = sshll.u32 %s263_s9, 4  ;;  %s159_s10 = int_to_ptr.vmem [resolvable:$true] %s158_s10 }
  0x28   :  { %s231_s2 = scalar_lea.vmem %s159_s10, 128  ;;  %p236_p3 = scmp.lt.s32.totalorder %s159_s10, %s159_s10 }
  0x29   :  { %p232_p2 = scmp.ne.s32.totalorder %s159_s10, %s231_s2  ;;  %p237_p4 = scmp.lt.s32.totalorder %s231_s2, %s231_s2 }
  0x2a   :  { %176 = vmatmul.mubr.msk.f32.vlgmr.msra.gmra.mrb[0].mxu0 %vm48_vm2, %v46_v2 }
  0x2b   :  { %p238_p5 = por %p237_p4, %p236_p3 }
  0x2d   :  { %v45_v3 = vld [vmem:[#allocation7] sm:$0xff]  ;;  %p239_p6 = pnand %p238_p5, %p232_p2 }
  0xfd   :  { %v121_v4 = vpop.f32.mrb[0].mxu0 }
  0xfe   :  { %v125_v5 = vadd.f32 %v121_v4, %v45_v3  ;;  %v177_v6 = vpop.f32.mrb[1].mxu0 }
 0x100   :  { %127 = vst.msk [vmem:[#allocation7] sm:$0xff] %vm43_vm0, %v125_v5 }
 0x107   :  { %v131_v8 = vld [vmem:[#allocation7] sm:$0xff] }
 0x108   :  { %v139_v9 = vadd.f32 %v170_v7, %v131_v8 }
 0x10a   :  { %v140_v10 = vsel %vm43_vm0, %v139_v9, -inf }
 0x10b   :  { %141 = vmax.xlane.f32.xlu0 %v140_v10 }
 0x198   :  { %v142_v11 = vpop.xlane.xlu0 %141 }
 0x199   :  { %v143_v12 = vsub.f32 %v139_v9, %v142_v11 }
 0x19b   :  { %v144_v13 = vmul.f32 1.442695, %v143_v12 }
 0x19d   :  { %183 = vpow2.f32 %v144_v13 }
 0x1a7   :  { %v184_v14 = vpop.eup %183 }
 0x1a8   :  { %v146_v15 = vsel %vm43_vm0, %v184_v14, 0.0 }
 0x1a9   :  { %147 = vadd.xlane.f32.xlu0 %v146_v15 }
 0x236   :  { %v148_v16 = vpop.xlane.xlu0 %147 }
 0x237   :  { %185 = vrcp.f32 %v148_v16 }
 0x241   :  { %v186_v17 = vpop.eup %185 }
 0x242   :  { %v150_v18 = vmul.f32 %v186_v17, %v184_v14 }
 0x244   :  { %151 = vst.msk [vmem:[#allocation7] sm:$0xff] %vm43_vm0, %v150_v18 }
 0x245   :  { %242 = shalt.err (!%p239_p6)
}
 0x246   :  { %s243_s13 = scalar_lea.hbm %s331_s3, 128 }
 0x247   :  { %p244_p7 = scmp.ne.s32.totalorder %s331_s3, %s243_s13  ;;  %p247_p8 = scmp.lt.u32.totalorder %s243_s13, %s331_s3 }
 0x249   :  { %p249_p9 = pnand %p247_p8, %p244_p7 }
 0x24b   :  { %252 = shalt.err (!%p249_p9)
}
 0x24c   :  { %161 = dma.vmem_to_hbm [thread:$0]  %s159_s10, 128, %s331_s3, [#allocation4]  }
 0x24d   :  { %257 = dma.done.wait [#allocation4], 128  }
 0x24e   :  { %258 = vsyncadd [#allocation4], 4294967168 }
 0x24f   :  { %165 = vsyncpa [#allocation3], 1 }
 0x250   :  { %166 = vsyncpa [#allocation6], 1 }
 0x251   :  { %167 = vsyncpa [#allocation4], 1 }

</bundles_post_ra>
